<compile_context>
chip_gen: v7x
topology: tpu7x:2x2x1
jax: 0.10.0
libtpu: 0.0.40
codegen_flags: <defaults>
</compile_context>

<pallas_src>
import functools

import jax
import jax.numpy as jnp
from jax.experimental import pallas as pl
from jax.experimental.pallas import tpu as pltpu


# ----------------------------------------------------------------------------
# Tiling helpers
# ----------------------------------------------------------------------------

def _pick_row_tile(n, cap=256):
    """Largest multiple of 8 dividing n, <= cap, preferring >=2 row blocks."""
    cap = min(cap, n // 2 if n >= 16 else n)
    best = None
    t = 8
    while t <= max(cap, 8):
        if n % t == 0:
            best = t
        t += 8
    return best if best is not None else n


def _pick_contract_tile(n, cap=512):
    """Contraction tile: either the full dim or a multiple of 128 dividing n."""
    if n <= cap:
        return n
    best = None
    t = 128
    while t <= cap:
        if n % t == 0:
            best = t
        t += 128
    return best if best is not None else n


def _gcn_vmem_limit(tm, tk, dp, fuse_norm):
    """Derive vmem_limit_bytes from the actual tiles (double-buffered)."""
    blk = (tm * tk * 2      # A tile (bf16)
           + tk * dp * 2    # X tile (bf16)
           + dp * dp * 2    # W (bf16, resident)
           + dp * 4         # bias (f32)
           + tm * dp * 4)   # output tile (f32)
    if fuse_norm:
        blk += tm * dp * 4  # residual (prev) tile (f32)
    total = 2 * blk + tm * dp * 4 + (8 << 20)   # double-buffer + scratch + slack
    return int(min(max(total, 16 << 20), 64 << 20))  # never above v7x's 64 MiB


# ----------------------------------------------------------------------------
# Pallas kernels
# ----------------------------------------------------------------------------

def _gcn_layer_kernel(a_ref, x_ref, w_ref, b_ref, *rest, fuse_norm):
    """One GCN layer, optionally fused with F.normalize(...) + residual.

    out = A_norm @ X @ W + b          (A_norm, X, W in bf16; f32 accumulation)
    if fuse_norm: out = out/||out|| + prev
    Grid: (rows "parallel", k-reduction "arbitrary"); acc_ref is VMEM scratch.
    """
    if fuse_norm:
        prev_ref, o_ref, acc_ref = rest
    else:
        o_ref, acc_ref = rest

    @pl.when(pl.program_id(1) == 0)
    def _init():
        acc_ref[...] = jnp.zeros_like(acc_ref)

    # (tm, tk) bf16 @ (tk, Dp) bf16 -> f32 accumulate   (contraction dim = N)
    acc_ref[...] += jnp.dot(a_ref[...], x_ref[...],
                            preferred_element_type=jnp.float32)

    @pl.when(pl.program_id(1) == pl.num_programs(1) - 1)
    def _finalize():
        # (tm, Dp) @ (Dp, Dp) -> f32, both contraction and output are 128 wide.
        h = jnp.dot(acc_ref[...].astype(jnp.bfloat16), w_ref[...],
                    preferred_element_type=jnp.float32) + b_ref[...]
        if fuse_norm:
            # F.normalize(h, dim=-1) + prev  (eps clamp like PyTorch, f32 math)
            nrm = jnp.sqrt(jnp.sum(h * h, axis=-1, keepdims=True))
            inv = pl.reciprocal(jnp.maximum(nrm, 1e-12), approx=True)
            h = h * inv + prev_ref[...]
        o_ref[...] = h


def gcn_layer(a_bf16, x_bf16, w_bf16, b_f32, prev_f32=None, *, fuse_norm=True):
    n = a_bf16.shape[0]
    dp = x_bf16.shape[1]
    tm = _pick_row_tile(n)
    tk = _pick_contract_tile(n)
    grid = (n // tm, n // tk)

    in_specs = [
        pl.BlockSpec((tm, tk), lambda i, k: (i, k)),   # A tile
        pl.BlockSpec((tk, dp), lambda i, k: (k, 0)),   # X tile
        pl.BlockSpec((dp, dp), lambda i, k: (0, 0)),   # W (resident)
        pl.BlockSpec((1, dp), lambda i, k: (0, 0)),    # bias
    ]
    args = [a_bf16, x_bf16, w_bf16, b_f32]
    if fuse_norm:
        in_specs.append(pl.BlockSpec((tm, dp), lambda i, k: (i, 0)))  # residual
        args.append(prev_f32)

    return pl.pallas_call(
        functools.partial(_gcn_layer_kernel, fuse_norm=fuse_norm),
        out_shape=jax.ShapeDtypeStruct((n, dp), jnp.float32),
        grid=grid,
        in_specs=in_specs,
        out_specs=pl.BlockSpec((tm, dp), lambda i, k: (i, 0)),
        scratch_shapes=[pltpu.VMEM((tm, dp), jnp.float32)],
        compiler_params=pltpu.CompilerParams(
            dimension_semantics=("parallel", "arbitrary"),
            vmem_limit_bytes=_gcn_vmem_limit(tm, tk, dp, fuse_norm),
        ),
    )(*args)


def _contrast_kernel(z1_ref, z2_ref, o_ref, *, taus):
    """All 6 HeCo-style InfoNCE terms in one launch (static unroll over pairs).

    Per pair p (z1, z2: [B, Dp], pos = identity):
        cos = (z1/||z1||) @ (z2/||z2||)^T          (clamped denominators)
        loss_i = -log(P_ii) = log(sum_j exp(cos_ij/tau) + 1e-8) - cos_ii/tau
    """
    for p, tau in enumerate(taus):
        inv_tau = 1.0 / float(tau)
        z1 = z1_ref[p]
        z2 = z2_ref[p]
        n1 = jnp.sqrt(jnp.sum(z1 * z1, axis=-1, keepdims=True))
        n2 = jnp.sqrt(jnp.sum(z2 * z2, axis=-1, keepdims=True))
        z1n = z1 * pl.reciprocal(jnp.maximum(n1, 1e-8), approx=True)
        z2n = z2 * pl.reciprocal(jnp.maximum(n2, 1e-8), approx=True)
        sim = jnp.dot(z1n, z2n.T, preferred_element_type=jnp.float32) * inv_tau
        rowsum = jnp.sum(jnp.exp(sim), axis=-1, keepdims=True)            # (B,1)
        diag = jnp.sum(z1n * z2n, axis=-1, keepdims=True) * inv_tau       # (B,1)
        o_ref[p] = jnp.log(rowsum + 1e-8) - diag


def contrast_losses(z1, z2, taus):
    """z1, z2: [P, B, Dp] f32; taus: tuple of P Python floats -> [P, B, 1]."""
    p, b, dp = z1.shape
    return pl.pallas_call(
        functools.partial(_contrast_kernel, taus=tuple(taus)),
        out_shape=jax.ShapeDtypeStruct((p, b, 1), jnp.float32),
        in_specs=[
            pl.BlockSpec((p, b, dp), lambda: (0, 0, 0)),
            pl.BlockSpec((p, b, dp), lambda: (0, 0, 0)),
        ],
        out_specs=pl.BlockSpec((p, b, 1), lambda: (0, 0, 0)),
    )(z1, z2)


# ----------------------------------------------------------------------------
# Glue (parameter setup, graph normalization, scalar-only losses)
# ----------------------------------------------------------------------------

def xavier_uniform(key, shape):
    fan_in, fan_out = shape[0], shape[1]
    bound = jnp.sqrt(6.0 / (fan_in + fan_out))
    return jax.random.uniform(key, shape, jnp.float32, -bound, bound)


def build_norm_adj(edge_index, n_nodes):
    """Dense D^-1/2 A D^-1/2 matching PyG GCNConv (add_self_loops=False)."""
    # TODO(synk): for production-size graphs replace this dense [N,N] matrix
    # with a blocked sparse SpMM (scalar-prefetched row offsets driving the
    # index_map); dense is fine only at toy N.
    row, col = edge_index  # messages flow row (source) -> col (target)
    deg = jnp.zeros((n_nodes,), jnp.float32).at[col].add(1.0)
    dinv = jnp.where(deg > 0, 1.0 / jnp.sqrt(jnp.maximum(deg, 1.0)), 0.0)
    w = dinv[row] * dinv[col]
    adj = jnp.zeros((n_nodes, n_nodes), jnp.float32).at[col, row].add(w)
    return adj  # adj[target, source]


def bpr_loss(pos, neg):
    # RecBole BPRLoss (gamma = 1e-10)
    return -jnp.mean(jnp.log(1e-10 + jax.nn.sigmoid(pos - neg)))


def emb_loss(user_w, item_w):
    # RecBole EmbLoss (p=2): sum of norms / last embedding's row count
    return (jnp.sqrt(jnp.sum(user_w * user_w))
            + jnp.sqrt(jnp.sum(item_w * item_w))) / item_w.shape[0]


class Config:
    n_users = 31
    n_items = 31
    embedding_size = 32
    padded_dim = 128            # embedding dim zero-padded to 128 lanes for MXU
    behaviors = ("view", "collect", "cart", "buy")
    layers = (1, 1, 1, 1)
    tua0 = tua1 = tua2 = tua3 = tua4 = tua5 = 0.2
    lamda = 0.1
    reg_weight = 1e-4


def init_params(key, cfg):
    d, dp = cfg.embedding_size, cfg.padded_dim
    n_w = sum(cfg.layers)
    keys = jax.random.split(key, 2 + n_w)
    params = {
        "user_emb": xavier_uniform(keys[0], (cfg.n_users + 1, d)),
        "item_emb": xavier_uniform(keys[1], (cfg.n_items + 1, d)),
        "gcn": {},
    }
    k = 2
    for bi, beh in enumerate(cfg.behaviors):
        lw = []
        for _ in range(cfg.layers[bi]):
            w = xavier_uniform(keys[k], (d, d))           # Glorot on the real fan
            w = jnp.pad(w, ((0, dp - d), (0, dp - d)))    # zero-pad: exact no-op
            b = jnp.zeros((1, dp), jnp.float32)
            lw.append((w, b))
            k += 1
        params["gcn"][beh] = lw
    return params


def make_edge_indices(key, cfg, n_edges=64):
    """Synthetic bipartite user-item graphs per behavior (both directions)."""
    n_nodes = (cfg.n_users + 1) + (cfg.n_items + 1)
    adjs = {}
    for bi, beh in enumerate(cfg.behaviors):
        ku, ki = jax.random.split(jax.random.fold_in(key, bi))
        users = jax.random.randint(ku, (n_edges,), 1, cfg.n_users + 1)
        items = jax.random.randint(ki, (n_edges,), 1, cfg.n_items + 1) + (cfg.n_users + 1)
        row = jnp.concatenate([users, items])
        col = jnp.concatenate([items, users])
        # bf16 adjacency for the MXU (halves VMEM/HBM bytes); f32 accumulation.
        adjs[beh] = build_norm_adj((row, col), n_nodes).astype(jnp.bfloat16)
    return adjs


def gcn_propagate(params, adjs, cfg):
    d, dp = cfg.embedding_size, cfg.padded_dim
    total = jnp.concatenate([params["user_emb"], params["item_emb"]], axis=0)
    total = jnp.pad(total, ((0, 0), (0, dp - d)))   # padded lanes stay exactly 0
    all_embeddings = {}
    for bi, beh in enumerate(cfg.behaviors):
        a = adjs[beh]
        x = total
        n_layers = cfg.layers[bi]
        for li in range(n_layers - 1):               # intermediate GCN layers (L>1)
            w, b = params["gcn"][beh][li]
            x = gcn_layer(a, x.astype(jnp.bfloat16), w.astype(jnp.bfloat16), b,
                          fuse_norm=False)
        w, b = params["gcn"][beh][n_layers - 1]
        # last layer fused with normalize + residual (single launch per behavior)
        total = gcn_layer(a, x.astype(jnp.bfloat16), w.astype(jnp.bfloat16), b,
                          prev_f32=total, fuse_norm=True)
        all_embeddings[beh] = total
    return all_embeddings


def crgcn_forward(params, adjs, batch_data, cfg):
    all_embeddings = gcn_propagate(params, adjs, cfg)
    n_users_p1 = cfg.n_users + 1

    def split(emb):
        return emb[:n_users_p1], emb[n_users_p1:]

    total_loss = 0.0
    users = None
    items = None
    for idx, beh in enumerate(cfg.behaviors):
        data = batch_data[:, idx]
        users = data[:, 0]
        items = data[:, 1:]
        user_all, item_all = split(all_embeddings[beh])
        u = user_all[users]                                  # [B, Dp]
        it = item_all[items]                                 # [B, K, Dp]
        # scores = sum(user_feature * item_feature, dim=-1): no broadcast copy,
        # no extra kernel launch (XLA fuses this trivially at these sizes).
        scores = jnp.einsum("bd,bkd->bk", u, it)
        total_loss = total_loss + bpr_loss(scores[:, 0], scores[:, 1])

    # contrastive terms reuse users/items from the LAST behavior, as in PyTorch
    u_p, i_p = split(all_embeddings["buy"])
    u_c, i_c = split(all_embeddings["cart"])
    u_v, i_v = split(all_embeddings["view"])
    u_co, i_co = split(all_embeddings["collect"])
    it0 = items[:, 0]

    z1 = jnp.stack([u_p[users], u_p[users], i_p[it0], i_p[it0], u_p[users], i_p[it0]])
    z2 = jnp.stack([u_c[users], u_v[users], i_c[it0], i_v[it0], u_co[users], i_co[it0]])
    taus = (cfg.tua0, cfg.tua1, cfg.tua2, cfg.tua3, cfg.tua4, cfg.tua5)
    per_row = contrast_losses(z1, z2, taus)                  # [6, B, 1]
    info_nce = jnp.sum(jnp.mean(per_row[:, :, 0], axis=1))

    total_loss = (
        total_loss
        + cfg.reg_weight * emb_loss(params["user_emb"], params["item_emb"])
        + cfg.lamda * info_nce
    )
    return total_loss


# ----------------------------------------------------------------------------
if __name__ == "__main__":
    cfg = Config()
    key = jax.random.PRNGKey(0)
    k_param, k_graph, k_batch_u, k_batch_i = jax.random.split(key, 4)

    params = init_params(k_param, cfg)
    adjs = make_edge_indices(k_graph, cfg)

    # batch_data: [B, n_behaviors, 3] = (user, pos_item, neg_item) per behavior
    B = 8
    nb = len(cfg.behaviors)
    batch_users = jax.random.randint(k_batch_u, (B, nb, 1), 1, cfg.n_users + 1)
    batch_items = jax.random.randint(k_batch_i, (B, nb, 2), 1, cfg.n_items + 1)
    batch_data = jnp.concatenate([batch_users, batch_items], axis=-1).astype(jnp.int32)

    fwd = jax.jit(functools.partial(crgcn_forward, cfg=cfg))
    loss = fwd(params, adjs, batch_data)
    jax.block_until_ready(loss)

    assert jnp.isfinite(loss), "loss is not finite"
    # TODO(synk): exact BPRLoss/EmbLoss/Contrast class definitions were not
    # shipped with the module; RecBole / HeCo reference formulations are used.
    print("KERNEL_OK")
</pallas_src>

<mosaic_0001>
module attributes {stable_mosaic.version = 11 : i64} {
  func.func @_gcn_layer_kernel(%arg0: i32, %arg1: i32, %arg2: memref<32x64xbf16, #tpu.memory_space<vmem>>, %arg3: memref<64x128xbf16, #tpu.memory_space<vmem>>, %arg4: memref<128x128xbf16, #tpu.memory_space<vmem>>, %arg5: memref<1x128xf32, #tpu.memory_space<vmem>>, %arg6: memref<32x128xf32, #tpu.memory_space<vmem>>, %arg7: memref<32x128xf32, #tpu.memory_space<vmem>>, %arg8: memref<32x128xf32, #tpu.memory_space<vmem>>) attributes {dimension_semantics = [#tpu.dimension_semantics<parallel>, #tpu.dimension_semantics<arbitrary>], iteration_bounds = array<i64: 2, 1>, scalar_prefetch = 0 : i64, scratch_operands = 1 : i64, tpu.core_type = #tpu.core_type<tc>, window_params = [{transform_indices = @transform_0, window_bounds = array<i64: 32, 64>}, {transform_indices = @transform_1, window_bounds = array<i64: 64, 128>}, {pipeline_mode = #tpu.pipeline_mode<synchronous>, transform_indices = @transform_2, window_bounds = array<i64: 128, 128>}, {pipeline_mode = #tpu.pipeline_mode<synchronous>, transform_indices = @transform_3, window_bounds = array<i64: 1, 128>}, {transform_indices = @transform_4, window_bounds = array<i64: 32, 128>}, {transform_indices = @transform_5, window_bounds = array<i64: 32, 128>}]} {
    %c0_i32 = arith.constant 0 : i32
    %0 = arith.cmpi eq, %arg1, %c0_i32 : i32
    %1 = arith.extui %0 : i1 to i32
    %c0_i32_0 = arith.constant 0 : i32
    %2 = arith.cmpi ne, %1, %c0_i32_0 : i32
    scf.if %2 {
      %cst_10 = arith.constant 0.000000e+00 : f32
      %12 = vector.broadcast %cst_10 : f32 to vector<32x128xf32>
      %c0_11 = arith.constant 0 : index
      %c0_12 = arith.constant 0 : index
      %13 = vector.load %arg8[%c0_11, %c0_12] : memref<32x128xf32, #tpu.memory_space<vmem>>, vector<32x128xf32>
      tpu.vector_store %arg8[%c0_11, %c0_12], %12 {strides = array<i32>} : memref<32x128xf32, #tpu.memory_space<vmem>>, vector<32x128xf32>,
    } else {
    }
    %c0 = arith.constant 0 : index
    %c0_1 = arith.constant 0 : index
    %3 = vector.load %arg8[%c0, %c0_1] : memref<32x128xf32, #tpu.memory_space<vmem>>, vector<32x128xf32>
    %c0_2 = arith.constant 0 : index
    %c0_3 = arith.constant 0 : index
    %4 = vector.load %arg2[%c0_2, %c0_3] : memref<32x64xbf16, #tpu.memory_space<vmem>>, vector<32x64xbf16>
    %c0_4 = arith.constant 0 : index
    %c0_5 = arith.constant 0 : index
    %5 = vector.load %arg3[%c0_4, %c0_5] : memref<64x128xbf16, #tpu.memory_space<vmem>>, vector<64x128xbf16>
    %cst = arith.constant dense<0.000000e+00> : vector<32x128xf32>
    %6 = tpu.matmul %4, %5, %cst {dimension_numbers = #tpu.dot_dimension_numbers<[1], [0], [0], [1], [0, 0, 1, 1], [], []>} : vector<32x64xbf16>, vector<64x128xbf16>, vector<32x128xf32> -> vector<32x128xf32>
    %7 = arith.addf %3, %6 : vector<32x128xf32>
    %c0_6 = arith.constant 0 : index
    %c0_7 = arith.constant 0 : index
    %8 = vector.load %arg8[%c0_6, %c0_7] : memref<32x128xf32, #tpu.memory_space<vmem>>, vector<32x128xf32>
    tpu.vector_store %arg8[%c0_6, %c0_7], %7 {strides = array<i32>} : memref<32x128xf32, #tpu.memory_space<vmem>>, vector<32x128xf32>,
    %c0_i32_8 = arith.constant 0 : i32
    %9 = arith.cmpi eq, %arg1, %c0_i32_8 : i32
    %10 = arith.extui %9 : i1 to i32
    %c0_i32_9 = arith.constant 0 : i32
    %11 = arith.cmpi ne, %10, %c0_i32_9 : i32
    scf.if %11 {
      %c0_10 = arith.constant 0 : index
      %c0_11 = arith.constant 0 : index
      %12 = vector.load %arg8[%c0_10, %c0_11] : memref<32x128xf32, #tpu.memory_space<vmem>>, vector<32x128xf32>
      %13 = arith.truncf %12 : vector<32x128xf32> to vector<32x128xbf16>
      %c0_12 = arith.constant 0 : index
      %c0_13 = arith.constant 0 : index
      %14 = vector.load %arg4[%c0_12, %c0_13] : memref<128x128xbf16, #tpu.memory_space<vmem>>, vector<128x128xbf16>
      %cst_14 = arith.constant dense<0.000000e+00> : vector<32x128xf32>
      %15 = tpu.matmul %13, %14, %cst_14 {dimension_numbers = #tpu.dot_dimension_numbers<[1], [0], [0], [1], [0, 0, 1, 1], [], []>} : vector<32x128xbf16>, vector<128x128xbf16>, vector<32x128xf32> -> vector<32x128xf32>
      %c0_15 = arith.constant 0 : index
      %c0_16 = arith.constant 0 : index
      %16 = vector.load %arg5[%c0_15, %c0_16] : memref<1x128xf32, #tpu.memory_space<vmem>>, vector<1x128xf32>
      %17 = vector.broadcast %16 : vector<1x128xf32> to vector<32x128xf32>
      %18 = arith.addf %15, %17 : vector<32x128xf32>
      %19 = arith.mulf %18, %18 : vector<32x128xf32>
      %cst_17 = arith.constant dense<0.000000e+00> : vector<32xf32>
      %20 = vector.multi_reduction <add>, %19, %cst_17 [1] : vector<32x128xf32> to vector<32xf32>
      %21 = vector.shape_cast %20 : vector<32xf32> to vector<32x1xf32>
      %22 = math.sqrt %21 : vector<32x1xf32>
      %cst_18 = arith.constant 9.99999996E-13 : f32
      %23 = vector.broadcast %cst_18 : f32 to vector<32x1xf32>
      %24 = arith.maximumf %22, %23 : vector<32x1xf32>
      %25 = tpu.reciprocal %24 {approx = true} : vector<32x1xf32> -> vector<32x1xf32>
      %26 = vector.broadcast %25 : vector<32x1xf32> to vector<32x128xf32>
      %27 = arith.mulf %18, %26 : vector<32x128xf32>
      %c0_19 = arith.constant 0 : index
      %c0_20 = arith.constant 0 : index
      %28 = vector.load %arg6[%c0_19, %c0_20] : memref<32x128xf32, #tpu.memory_space<vmem>>, vector<32x128xf32>
      %29 = arith.addf %27, %28 : vector<32x128xf32>
      %c0_21 = arith.constant 0 : index
      %c0_22 = arith.constant 0 : index
      %30 = vector.load %arg7[%c0_21, %c0_22] : memref<32x128xf32, #tpu.memory_space<vmem>>, vector<32x128xf32>
      tpu.vector_store %arg7[%c0_21, %c0_22], %29 {strides = array<i32>} : memref<32x128xf32, #tpu.memory_space<vmem>>, vector<32x128xf32>,
    } else {
    }
    return
  }
  func.func @transform_0(%arg0: i32, %arg1: i32) -> (i32, i32) {
    %c0_i32 = arith.constant 0 : i32
    return %arg0, %arg1 : i32, i32
  }
  func.func @transform_1(%arg0: i32, %arg1: i32) -> (i32, i32) {
    %c0_i32 = arith.constant 0 : i32
    %c0_i32_0 = arith.constant 0 : i32
    return %arg1, %c0_i32 : i32, i32
  }
  func.func @transform_2(%arg0: i32, %arg1: i32) -> (i32, i32) {
    %c0_i32 = arith.constant 0 : i32
    %c0_i32_0 = arith.constant 0 : i32
    %c0_i32_1 = arith.constant 0 : i32
    return %c0_i32, %c0_i32_0 : i32, i32
  }
  func.func @transform_3(%arg0: i32, %arg1: i32) -> (i32, i32) {
    %c0_i32 = arith.constant 0 : i32
    %c0_i32_0 = arith.constant 0 : i32
    %c0_i32_1 = arith.constant 0 : i32
    return %c0_i32, %c0_i32_0 : i32, i32
  }
  func.func @transform_4(%arg0: i32, %arg1: i32) -> (i32, i32) {
    %c0_i32 = arith.constant 0 : i32
    %c0_i32_0 = arith.constant 0 : i32
    return %arg0, %c0_i32 : i32, i32
  }
  func.func @transform_5(%arg0: i32, %arg1: i32) -> (i32, i32) {
    %c0_i32 = arith.constant 0 : i32
    %c0_i32_0 = arith.constant 0 : i32
    return %arg0, %c0_i32 : i32, i32
  }
}

module attributes {stable_mosaic.version = 11 : i64} {
  func.func @_contrast_kernel(%arg0: memref<6x8x128xf32, #tpu.memory_space<vmem>>, %arg1: memref<6x8x128xf32, #tpu.memory_space<vmem>>, %arg2: memref<6x8x1xf32, #tpu.memory_space<vmem>>) attributes {dimension_semantics = [], scalar_prefetch = 0 : i64, scratch_operands = 0 : i64, tpu.core_type = #tpu.core_type<tc>} {
    %c0 = arith.constant 0 : index
    %c0_0 = arith.constant 0 : index
    %c0_1 = arith.constant 0 : index
    %0 = vector.load %arg0[%c0, %c0_0, %c0_1] : memref<6x8x128xf32, #tpu.memory_space<vmem>>, vector<1x8x128xf32>
    %1 = vector.shape_cast %0 : vector<1x8x128xf32> to vector<8x128xf32>
    %c0_2 = arith.constant 0 : index
    %c0_3 = arith.constant 0 : index
    %c0_4 = arith.constant 0 : index
    %2 = vector.load %arg1[%c0_2, %c0_3, %c0_4] : memref<6x8x128xf32, #tpu.memory_space<vmem>>, vector<1x8x128xf32>
    %3 = vector.shape_cast %2 : vector<1x8x128xf32> to vector<8x128xf32>
    %4 = arith.mulf %1, %1 : vector<8x128xf32>
    %cst = arith.constant dense<0.000000e+00> : vector<8xf32>
    %5 = vector.multi_reduction <add>, %4, %cst [1] : vector<8x128xf32> to vector<8xf32>
    %6 = vector.shape_cast %5 : vector<8xf32> to vector<8x1xf32>
    %7 = math.sqrt %6 : vector<8x1xf32>
    %8 = arith.mulf %3, %3 : vector<8x128xf32>
    %cst_5 = arith.constant dense<0.000000e+00> : vector<8xf32>
    %9 = vector.multi_reduction <add>, %8, %cst_5 [1] : vector<8x128xf32> to vector<8xf32>
    %10 = vector.shape_cast %9 : vector<8xf32> to vector<8x1xf32>
    %11 = math.sqrt %10 : vector<8x1xf32>
    %cst_6 = arith.constant 9.99999993E-9 : f32
    %12 = vector.broadcast %cst_6 : f32 to vector<8x1xf32>
    %13 = arith.maximumf %7, %12 : vector<8x1xf32>
    %14 = tpu.reciprocal %13 {approx = true} : vector<8x1xf32> -> vector<8x1xf32>
    %15 = vector.broadcast %14 : vector<8x1xf32> to vector<8x128xf32>
    %16 = arith.mulf %1, %15 : vector<8x128xf32>
    %cst_7 = arith.constant 9.99999993E-9 : f32
    %17 = vector.broadcast %cst_7 : f32 to vector<8x1xf32>
    %18 = arith.maximumf %11, %17 : vector<8x1xf32>
    %19 = tpu.reciprocal %18 {approx = true} : vector<8x1xf32> -> vector<8x1xf32>
    %20 = vector.broadcast %19 : vector<8x1xf32> to vector<8x128xf32>
    %21 = arith.mulf %3, %20 : vector<8x128xf32>
    %22 = tpu.transpose %21, [1, 0] : vector<8x128xf32> -> vector<128x8xf32>
    %cst_8 = arith.constant dense<0.000000e+00> : vector<8x8xf32>
    %23 = tpu.matmul %16, %22, %cst_8 {dimension_numbers = #tpu.dot_dimension_numbers<[1], [0], [0], [1], [0, 0, 1, 1], [], []>} : vector<8x128xf32>, vector<128x8xf32>, vector<8x8xf32> -> vector<8x8xf32>
    %cst_9 = arith.constant 5.000000e+00 : f32
    %24 = vector.broadcast %cst_9 : f32 to vector<8x8xf32>
    %25 = arith.mulf %23, %24 : vector<8x8xf32>
    %26 = math.exp %25 : vector<8x8xf32>
    %cst_10 = arith.constant dense<0.000000e+00> : vector<8xf32>
    %27 = vector.multi_reduction <add>, %26, %cst_10 [1] : vector<8x8xf32> to vector<8xf32>
    %28 = vector.shape_cast %27 : vector<8xf32> to vector<8x1xf32>
    %29 = arith.mulf %16, %21 : vector<8x128xf32>
    %cst_11 = arith.constant dense<0.000000e+00> : vector<8xf32>
    %30 = vector.multi_reduction <add>, %29, %cst_11 [1] : vector<8x128xf32> to vector<8xf32>
    %31 = vector.shape_cast %30 : vector<8xf32> to vector<8x1xf32>
    %cst_12 = arith.constant 5.000000e+00 : f32
    %32 = vector.broadcast %cst_12 : f32 to vector<8x1xf32>
    %33 = arith.mulf %31, %32 : vector<8x1xf32>
    %cst_13 = arith.constant 9.99999993E-9 : f32
    %34 = vector.broadcast %cst_13 : f32 to vector<8x1xf32>
    %35 = arith.addf %28, %34 : vector<8x1xf32>
    %36 = math.log %35 : vector<8x1xf32>
    %37 = arith.subf %36, %33 : vector<8x1xf32>
    %c0_14 = arith.constant 0 : index
    %c0_15 = arith.constant 0 : index
    %c0_16 = arith.constant 0 : index
    %38 = vector.load %arg2[%c0_14, %c0_15, %c0_16] : memref<6x8x1xf32, #tpu.memory_space<vmem>>, vector<1x8x1xf32>
    %39 = vector.shape_cast %38 : vector<1x8x1xf32> to vector<8x1xf32>
    %40 = vector.shape_cast %37 : vector<8x1xf32> to vector<1x8x1xf32>
    tpu.vector_store %arg2[%c0_14, %c0_15, %c0_16], %40 {strides = array<i32>} : memref<6x8x1xf32, #tpu.memory_space<vmem>>, vector<1x8x1xf32>,
    %c1 = arith.constant 1 : index
    %c0_17 = arith.constant 0 : index
    %c0_18 = arith.constant 0 : index
    %41 = vector.load %arg0[%c1, %c0_17, %c0_18] : memref<6x8x128xf32, #tpu.memory_space<vmem>>, vector<1x8x128xf32>
    %42 = vector.shape_cast %41 : vector<1x8x128xf32> to vector<8x128xf32>
    %c1_19 = arith.constant 1 : index
    %c0_20 = arith.constant 0 : index
    %c0_21 = arith.constant 0 : index
    %43 = vector.load %arg1[%c1_19, %c0_20, %c0_21] : memref<6x8x128xf32, #tpu.memory_space<vmem>>, vector<1x8x128xf32>
    %44 = vector.shape_cast %43 : vector<1x8x128xf32> to vector<8x128xf32>
    %45 = arith.mulf %42, %42 : vector<8x128xf32>
    %cst_22 = arith.constant dense<0.000000e+00> : vector<8xf32>
    %46 = vector.multi_reduction <add>, %45, %cst_22 [1] : vector<8x128xf32> to vector<8xf32>
    %47 = vector.shape_cast %46 : vector<8xf32> to vector<8x1xf32>
    %48 = math.sqrt %47 : vector<8x1xf32>
    %49 = arith.mulf %44, %44 : vector<8x128xf32>
    %cst_23 = arith.constant dense<0.000000e+00> : vector<8xf32>
    %50 = vector.multi_reduction <add>, %49, %cst_23 [1] : vector<8x128xf32> to vector<8xf32>
    %51 = vector.shape_cast %50 : vector<8xf32> to vector<8x1xf32>
    %52 = math.sqrt %51 : vector<8x1xf32>
    %cst_24 = arith.constant 9.99999993E-9 : f32
    %53 = vector.broadcast %cst_24 : f32 to vector<8x1xf32>
    %54 = arith.maximumf %48, %53 : vector<8x1xf32>
    %55 = tpu.reciprocal %54 {approx = true} : vector<8x1xf32> -> vector<8x1xf32>
    %56 = vector.broadcast %55 : vector<8x1xf32> to vector<8x128xf32>
    %57 = arith.mulf %42, %56 : vector<8x128xf32>
    %cst_25 = arith.constant 9.99999993E-9 : f32
    %58 = vector.broadcast %cst_25 : f32 to vector<8x1xf32>
    %59 = arith.maximumf %52, %58 : vector<8x1xf32>
    %60 = tpu.reciprocal %59 {approx = true} : vector<8x1xf32> -> vector<8x1xf32>
    %61 = vector.broadcast %60 : vector<8x1xf32> to vector<8x128xf32>
    %62 = arith.mulf %44, %61 : vector<8x128xf32>
    %63 = tpu.transpose %62, [1, 0] : vector<8x128xf32> -> vector<128x8xf32>
    %cst_26 = arith.constant dense<0.000000e+00> : vector<8x8xf32>
    %64 = tpu.matmul %57, %63, %cst_26 {dimension_numbers = #tpu.dot_dimension_numbers<[1], [0], [0], [1], [0, 0, 1, 1], [], []>} : vector<8x128xf32>, vector<128x8xf32>, vector<8x8xf32> -> vector<8x8xf32>
    %cst_27 = arith.constant 5.000000e+00 : f32
    %65 = vector.broadcast %cst_27 : f32 to vector<8x8xf32>
    %66 = arith.mulf %64, %65 : vector<8x8xf32>
    %67 = math.exp %66 : vector<8x8xf32>
    %cst_28 = arith.constant dense<0.000000e+00> : vector<8xf32>
    %68 = vector.multi_reduction <add>, %67, %cst_28 [1] : vector<8x8xf32> to vector<8xf32>
    %69 = vector.shape_cast %68 : vector<8xf32> to vector<8x1xf32>
    %70 = arith.mulf %57, %62 : vector<8x128xf32>
    %cst_29 = arith.constant dense<0.000000e+00> : vector<8xf32>
    %71 = vector.multi_reduction <add>, %70, %cst_29 [1] : vector<8x128xf32> to vector<8xf32>
    %72 = vector.shape_cast %71 : vector<8xf32> to vector<8x1xf32>
    %cst_30 = arith.constant 5.000000e+00 : f32
    %73 = vector.broadcast %cst_30 : f32 to vector<8x1xf32>
    %74 = arith.mulf %72, %73 : vector<8x1xf32>
    %cst_31 = arith.constant 9.99999993E-9 : f32
    %75 = vector.broadcast %cst_31 : f32 to vector<8x1xf32>
    %76 = arith.addf %69, %75 : vector<8x1xf32>
    %77 = math.log %76 : vector<8x1xf32>
    %78 = arith.subf %77, %74 : vector<8x1xf32>
    %c1_32 = arith.constant 1 : index
    %c0_33 = arith.constant 0 : index
    %c0_34 = arith.constant 0 : index
    %79 = vector.load %arg2[%c1_32, %c0_33, %c0_34] : memref<6x8x1xf32, #tpu.memory_space<vmem>>, vector<1x8x1xf32>
    %80 = vector.shape_cast %79 : vector<1x8x1xf32> to vector<8x1xf32>
    %81 = vector.shape_cast %78 : vector<8x1xf32> to vector<1x8x1xf32>
    tpu.vector_store %arg2[%c1_32, %c0_33, %c0_34], %81 {strides = array<i32>} : memref<6x8x1xf32, #tpu.memory_space<vmem>>, vector<1x8x1xf32>,
    %c2 = arith.constant 2 : index
    %c0_35 = arith.constant 0 : index
    %c0_36 = arith.constant 0 : index
    %82 = vector.load %arg0[%c2, %c0_35, %c0_36] : memref<6x8x128xf32, #tpu.memory_space<vmem>>, vector<1x8x128xf32>
    %83 = vector.shape_cast %82 : vector<1x8x128xf32> to vector<8x128xf32>
    %c2_37 = arith.constant 2 : index
    %c0_38 = arith.constant 0 : index
    %c0_39 = arith.constant 0 : index
    %84 = vector.load %arg1[%c2_37, %c0_38, %c0_39] : memref<6x8x128xf32, #tpu.memory_space<vmem>>, vector<1x8x128xf32>
    %85 = vector.shape_cast %84 : vector<1x8x128xf32> to vector<8x128xf32>
    %86 = arith.mulf %83, %83 : vector<8x128xf32>
    %cst_40 = arith.constant dense<0.000000e+00> : vector<8xf32>
    %87 = vector.multi_reduction <add>, %86, %cst_40 [1] : vector<8x128xf32> to vector<8xf32>
    %88 = vector.shape_cast %87 : vector<8xf32> to vector<8x1xf32>
    %89 = math.sqrt %88 : vector<8x1xf32>
    %90 = arith.mulf %85, %85 : vector<8x128xf32>
    %cst_41 = arith.constant dense<0.000000e+00> : vector<8xf32>
    %91 = vector.multi_reduction <add>, %90, %cst_41 [1] : vector<8x128xf32> to vector<8xf32>
    %92 = vector.shape_cast %91 : vector<8xf32> to vector<8x1xf32>
    %93 = math.sqrt %92 : vector<8x1xf32>
    %cst_42 = arith.constant 9.99999993E-9 : f32
    %94 = vector.broadcast %cst_42 : f32 to vector<8x1xf32>
    %95 = arith.maximumf %89, %94 : vector<8x1xf32>
    %96 = tpu.reciprocal %95 {approx = true} : vector<8x1xf32> -> vector<8x1xf32>
    %97 = vector.broadcast %96 : vector<8x1xf32> to vector<8x128xf32>
    %98 = arith.mulf %83, %97 : vector<8x128xf32>
    %cst_43 = arith.constant 9.99999993E-9 : f32
    %99 = vector.broadcast %cst_43 : f32 to vector<8x1xf32>
    %100 = arith.maximumf %93, %99 : vector<8x1xf32>
    %101 = tpu.reciprocal %100 {approx = true} : vector<8x1xf32> -> vector<8x1xf32>
    %102 = vector.broadcast %101 : vector<8x1xf32> to vector<8x128xf32>
    %103 = arith.mulf %85, %102 : vector<8x128xf32>
    %104 = tpu.transpose %103, [1, 0] : vector<8x128xf32> -> vector<128x8xf32>
    %cst_44 = arith.constant dense<0.000000e+00> : vector<8x8xf32>
    %105 = tpu.matmul %98, %104, %cst_44 {dimension_numbers = #tpu.dot_dimension_numbers<[1], [0], [0], [1], [0, 0, 1, 1], [], []>} : vector<8x128xf32>, vector<128x8xf32>, vector<8x8xf32> -> vector<8x8xf32>
    %cst_45 = arith.constant 5.000000e+00 : f32
    %106 = vector.broadcast %cst_45 : f32 to vector<8x8xf32>
    %107 = arith.mulf %105, %106 : vector<8x8xf32>
    %108 = math.exp %107 : vector<8x8xf32>
    %cst_46 = arith.constant dense<0.000000e+00> : vector<8xf32>
    %109 = vector.multi_reduction <add>, %108, %cst_46 [1] : vector<8x8xf32> to vector<8xf32>
    %110 = vector.shape_cast %109 : vector<8xf32> to vector<8x1xf32>
    %111 = arith.mulf %98, %103 : vector<8x128xf32>
    %cst_47 = arith.constant dense<0.000000e+00> : vector<8xf32>
    %112 = vector.multi_reduction <add>, %111, %cst_47 [1] : vector<8x128xf32> to vector<8xf32>
    %113 = vector.shape_cast %112 : vector<8xf32> to vector<8x1xf32>
    %cst_48 = arith.constant 5.000000e+00 : f32
    %114 = vector.broadcast %cst_48 : f32 to vector<8x1xf32>
    %115 = arith.mulf %113, %114 : vector<8x1xf32>
    %cst_49 = arith.constant 9.99999993E-9 : f32
    %116 = vector.broadcast %cst_49 : f32 to vector<8x1xf32>
    %117 = arith.addf %110, %116 : vector<8x1xf32>
    %118 = math.log %117 : vector<8x1xf32>
    %119 = arith.subf %118, %115 : vector<8x1xf32>
    %c2_50 = arith.constant 2 : index
    %c0_51 = arith.constant 0 : index
    %c0_52 = arith.constant 0 : index
    %120 = vector.load %arg2[%c2_50, %c0_51, %c0_52] : memref<6x8x1xf32, #tpu.memory_space<vmem>>, vector<1x8x1xf32>
    %121 = vector.shape_cast %120 : vector<1x8x1xf32> to vector<8x1xf32>
    %122 = vector.shape_cast %119 : vector<8x1xf32> to vector<1x8x1xf32>
    tpu.vector_store %arg2[%c2_50, %c0_51, %c0_52], %122 {strides = array<i32>} : memref<6x8x1xf32, #tpu.memory_space<vmem>>, vector<1x8x1xf32>,
    %c3 = arith.constant 3 : index
    %c0_53 = arith.constant 0 : index
    %c0_54 = arith.constant 0 : index
    %123 = vector.load %arg0[%c3, %c0_53, %c0_54] : memref<6x8x128xf32, #tpu.memory_space<vmem>>, vector<1x8x128xf32>
    %124 = vector.shape_cast %123 : vector<1x8x128xf32> to vector<8x128xf32>
    %c3_55 = arith.constant 3 : index
    %c0_56 = arith.constant 0 : index
    %c0_57 = arith.constant 0 : index
    %125 = vector.load %arg1[%c3_55, %c0_56, %c0_57] : memref<6x8x128xf32, #tpu.memory_space<vmem>>, vector<1x8x128xf32>
    %126 = vector.shape_cast %125 : vector<1x8x128xf32> to vector<8x128xf32>
    %127 = arith.mulf %124, %124 : vector<8x128xf32>
    %cst_58 = arith.constant dense<0.000000e+00> : vector<8xf32>
    %128 = vector.multi_reduction <add>, %127, %cst_58 [1] : vector<8x128xf32> to vector<8xf32>
    %129 = vector.shape_cast %128 : vector<8xf32> to vector<8x1xf32>
    %130 = math.sqrt %129 : vector<8x1xf32>
    %131 = arith.mulf %126, %126 : vector<8x128xf32>
    %cst_59 = arith.constant dense<0.000000e+00> : vector<8xf32>
    %132 = vector.multi_reduction <add>, %131, %cst_59 [1] : vector<8x128xf32> to vector<8xf32>
    %133 = vector.shape_cast %132 : vector<8xf32> to vector<8x1xf32>
    %134 = math.sqrt %133 : vector<8x1xf32>
    %cst_60 = arith.constant 9.99999993E-9 : f32
    %135 = vector.broadcast %cst_60 : f32 to vector<8x1xf32>
    %136 = arith.maximumf %130, %135 : vector<8x1xf32>
    %137 = tpu.reciprocal %136 {approx = true} : vector<8x1xf32> -> vector<8x1xf32>
    %138 = vector.broadcast %137 : vector<8x1xf32> to vector<8x128xf32>
    %139 = arith.mulf %124, %138 : vector<8x128xf32>
    %cst_61 = arith.constant 9.99999993E-9 : f32
    %140 = vector.broadcast %cst_61 : f32 to vector<8x1xf32>
    %141 = arith.maximumf %134, %140 : vector<8x1xf32>
    %142 = tpu.reciprocal %141 {approx = true} : vector<8x1xf32> -> vector<8x1xf32>
    %143 = vector.broadcast %142 : vector<8x1xf32> to vector<8x128xf32>
    %144 = arith.mulf %126, %143 : vector<8x128xf32>
    %145 = tpu.transpose %144, [1, 0] : vector<8x128xf32> -> vector<128x8xf32>
    %cst_62 = arith.constant dense<0.000000e+00> : vector<8x8xf32>
    %146 = tpu.matmul %139, %145, %cst_62 {dimension_numbers = #tpu.dot_dimension_numbers<[1], [0], [0], [1], [0, 0, 1, 1], [], []>} : vector<8x128xf32>, vector<128x8xf32>, vector<8x8xf32> -> vector<8x8xf32>
    %cst_63 = arith.constant 5.000000e+00 : f32
    %147 = vector.broadcast %cst_63 : f32 to vector<8x8xf32>
    %148 = arith.mulf %146, %147 : vector<8x8xf32>
    %149 = math.exp %148 : vector<8x8xf32>
    %cst_64 = arith.constant dense<0.000000e+00> : vector<8xf32>
    %150 = vector.multi_reduction <add>, %149, %cst_64 [1] : vector<8x8xf32> to vector<8xf32>
    %151 = vector.shape_cast %150 : vector<8xf32> to vector<8x1xf32>
    %152 = arith.mulf %139, %144 : vector<8x128xf32>
    %cst_65 = arith.constant dense<0.000000e+00> : vector<8xf32>
    %153 = vector.multi_reduction <add>, %152, %cst_65 [1] : vector<8x128xf32> to vector<8xf32>
    %154 = vector.shape_cast %153 : vector<8xf32> to vector<8x1xf32>
    %cst_66 = arith.constant 5.000000e+00 : f32
    %155 = vector.broadcast %cst_66 : f32 to vector<8x1xf32>
    %156 = arith.mulf %154, %155 : vector<8x1xf32>
    %cst_67 = arith.constant 9.99999993E-9 : f32
    %157 = vector.broadcast %cst_67 : f32 to vector<8x1xf32>
    %158 = arith.addf %151, %157 : vector<8x1xf32>
    %159 = math.log %158 : vector<8x1xf32>
    %160 = arith.subf %159, %156 : vector<8x1xf32>
    %c3_68 = arith.constant 3 : index
    %c0_69 = arith.constant 0 : index
    %c0_70 = arith.constant 0 : index
    %161 = vector.load %arg2[%c3_68, %c0_69, %c0_70] : memref<6x8x1xf32, #tpu.memory_space<vmem>>, vector<1x8x1xf32>
    %162 = vector.shape_cast %161 : vector<1x8x1xf32> to vector<8x1xf32>
    %163 = vector.shape_cast %160 : vector<8x1xf32> to vector<1x8x1xf32>
    tpu.vector_store %arg2[%c3_68, %c0_69, %c0_70], %163 {strides = array<i32>} : memref<6x8x1xf32, #tpu.memory_space<vmem>>, vector<1x8x1xf32>,
    %c4 = arith.constant 4 : index
    %c0_71 = arith.constant 0 : index
    %c0_72 = arith.constant 0 : index
    %164 = vector.load %arg0[%c4, %c0_71, %c0_72] : memref<6x8x128xf32, #tpu.memory_space<vmem>>, vector<1x8x128xf32>
    %165 = vector.shape_cast %164 : vector<1x8x128xf32> to vector<8x128xf32>
    %c4_73 = arith.constant 4 : index
    %c0_74 = arith.constant 0 : index
    %c0_75 = arith.constant 0 : index
    %166 = vector.load %arg1[%c4_73, %c0_74, %c0_75] : memref<6x8x128xf32, #tpu.memory_space<vmem>>, vector<1x8x128xf32>
    %167 = vector.shape_cast %166 : vector<1x8x128xf32> to vector<8x128xf32>
    %168 = arith.mulf %165, %165 : vector<8x128xf32>
    %cst_76 = arith.constant dense<0.000000e+00> : vector<8xf32>
    %169 = vector.multi_reduction <add>, %168, %cst_76 [1] : vector<8x128xf32> to vector<8xf32>
    %170 = vector.shape_cast %169 : vector<8xf32> to vector<8x1xf32>
    %171 = math.sqrt %170 : vector<8x1xf32>
    %172 = arith.mulf %167, %167 : vector<8x128xf32>
    %cst_77 = arith.constant dense<0.000000e+00> : vector<8xf32>
    %173 = vector.multi_reduction <add>, %172, %cst_77 [1] : vector<8x128xf32> to vector<8xf32>
    %174 = vector.shape_cast %173 : vector<8xf32> to vector<8x1xf32>
    %175 = math.sqrt %174 : vector<8x1xf32>
    %cst_78 = arith.constant 9.99999993E-9 : f32
    %176 = vector.broadcast %cst_78 : f32 to vector<8x1xf32>
    %177 = arith.maximumf %171, %176 : vector<8x1xf32>
    %178 = tpu.reciprocal %177 {approx = true} : vector<8x1xf32> -> vector<8x1xf32>
    %179 = vector.broadcast %178 : vector<8x1xf32> to vector<8x128xf32>
    %180 = arith.mulf %165, %179 : vector<8x128xf32>
    %cst_79 = arith.constant 9.99999993E-9 : f32
    %181 = vector.broadcast %cst_79 : f32 to vector<8x1xf32>
    %182 = arith.maximumf %175, %181 : vector<8x1xf32>
    %183 = tpu.reciprocal %182 {approx = true} : vector<8x1xf32> -> vector<8x1xf32>
    %184 = vector.broadcast %183 : vector<8x1xf32> to vector<8x128xf32>
    %185 = arith.mulf %167, %184 : vector<8x128xf32>
    %186 = tpu.transpose %185, [1, 0] : vector<8x128xf32> -> vector<128x8xf32>
    %cst_80 = arith.constant dense<0.000000e+00> : vector<8x8xf32>
    %187 = tpu.matmul %180, %186, %cst_80 {dimension_numbers = #tpu.dot_dimension_numbers<[1], [0], [0], [1], [0, 0, 1, 1], [], []>} : vector<8x128xf32>, vector<128x8xf32>, vector<8x8xf32> -> vector<8x8xf32>
    %cst_81 = arith.constant 5.000000e+00 : f32
    %188 = vector.broadcast %cst_81 : f32 to vector<8x8xf32>
    %189 = arith.mulf %187, %188 : vector<8x8xf32>
    %190 = math.exp %189 : vector<8x8xf32>
    %cst_82 = arith.constant dense<0.000000e+00> : vector<8xf32>
    %191 = vector.multi_reduction <add>, %190, %cst_82 [1] : vector<8x8xf32> to vector<8xf32>
    %192 = vector.shape_cast %191 : vector<8xf32> to vector<8x1xf32>
    %193 = arith.mulf %180, %185 : vector<8x128xf32>
    %cst_83 = arith.constant dense<0.000000e+00> : vector<8xf32>
    %194 = vector.multi_reduction <add>, %193, %cst_83 [1] : vector<8x128xf32> to vector<8xf32>
    %195 = vector.shape_cast %194 : vector<8xf32> to vector<8x1xf32>
    %cst_84 = arith.constant 5.000000e+00 : f32
    %196 = vector.broadcast %cst_84 : f32 to vector<8x1xf32>
    %197 = arith.mulf %195, %196 : vector<8x1xf32>
    %cst_85 = arith.constant 9.99999993E-9 : f32
    %198 = vector.broadcast %cst_85 : f32 to vector<8x1xf32>
    %199 = arith.addf %192, %198 : vector<8x1xf32>
    %200 = math.log %199 : vector<8x1xf32>
    %201 = arith.subf %200, %197 : vector<8x1xf32>
    %c4_86 = arith.constant 4 : index
    %c0_87 = arith.constant 0 : index
    %c0_88 = arith.constant 0 : index
    %202 = vector.load %arg2[%c4_86, %c0_87, %c0_88] : memref<6x8x1xf32, #tpu.memory_space<vmem>>, vector<1x8x1xf32>
    %203 = vector.shape_cast %202 : vector<1x8x1xf32> to vector<8x1xf32>
    %204 = vector.shape_cast %201 : vector<8x1xf32> to vector<1x8x1xf32>
    tpu.vector_store %arg2[%c4_86, %c0_87, %c0_88], %204 {strides = array<i32>} : memref<6x8x1xf32, #tpu.memory_space<vmem>>, vector<1x8x1xf32>,
    %c5 = arith.constant 5 : index
    %c0_89 = arith.constant 0 : index
    %c0_90 = arith.constant 0 : index
    %205 = vector.load %arg0[%c5, %c0_89, %c0_90] : memref<6x8x128xf32, #tpu.memory_space<vmem>>, vector<1x8x128xf32>
    %206 = vector.shape_cast %205 : vector<1x8x128xf32> to vector<8x128xf32>
    %c5_91 = arith.constant 5 : index
    %c0_92 = arith.constant 0 : index
    %c0_93 = arith.constant 0 : index
    %207 = vector.load %arg1[%c5_91, %c0_92, %c0_93] : memref<6x8x128xf32, #tpu.memory_space<vmem>>, vector<1x8x128xf32>
    %208 = vector.shape_cast %207 : vector<1x8x128xf32> to vector<8x128xf32>
    %209 = arith.mulf %206, %206 : vector<8x128xf32>
    %cst_94 = arith.constant dense<0.000000e+00> : vector<8xf32>
    %210 = vector.multi_reduction <add>, %209, %cst_94 [1] : vector<8x128xf32> to vector<8xf32>
    %211 = vector.shape_cast %210 : vector<8xf32> to vector<8x1xf32>
    %212 = math.sqrt %211 : vector<8x1xf32>
    %213 = arith.mulf %208, %208 : vector<8x128xf32>
    %cst_95 = arith.constant dense<0.000000e+00> : vector<8xf32>
    %214 = vector.multi_reduction <add>, %213, %cst_95 [1] : vector<8x128xf32> to vector<8xf32>
    %215 = vector.shape_cast %214 : vector<8xf32> to vector<8x1xf32>
    %216 = math.sqrt %215 : vector<8x1xf32>
    %cst_96 = arith.constant 9.99999993E-9 : f32
    %217 = vector.broadcast %cst_96 : f32 to vector<8x1xf32>
    %218 = arith.maximumf %212, %217 : vector<8x1xf32>
    %219 = tpu.reciprocal %218 {approx = true} : vector<8x1xf32> -> vector<8x1xf32>
    %220 = vector.broadcast %219 : vector<8x1xf32> to vector<8x128xf32>
    %221 = arith.mulf %206, %220 : vector<8x128xf32>
    %cst_97 = arith.constant 9.99999993E-9 : f32
    %222 = vector.broadcast %cst_97 : f32 to vector<8x1xf32>
    %223 = arith.maximumf %216, %222 : vector<8x1xf32>
    %224 = tpu.reciprocal %223 {approx = true} : vector<8x1xf32> -> vector<8x1xf32>
    %225 = vector.broadcast %224 : vector<8x1xf32> to vector<8x128xf32>
    %226 = arith.mulf %208, %225 : vector<8x128xf32>
    %227 = tpu.transpose %226, [1, 0] : vector<8x128xf32> -> vector<128x8xf32>
    %cst_98 = arith.constant dense<0.000000e+00> : vector<8x8xf32>
    %228 = tpu.matmul %221, %227, %cst_98 {dimension_numbers = #tpu.dot_dimension_numbers<[1], [0], [0], [1], [0, 0, 1, 1], [], []>} : vector<8x128xf32>, vector<128x8xf32>, vector<8x8xf32> -> vector<8x8xf32>
    %cst_99 = arith.constant 5.000000e+00 : f32
    %229 = vector.broadcast %cst_99 : f32 to vector<8x8xf32>
    %230 = arith.mulf %228, %229 : vector<8x8xf32>
    %231 = math.exp %230 : vector<8x8xf32>
    %cst_100 = arith.constant dense<0.000000e+00> : vector<8xf32>
    %232 = vector.multi_reduction <add>, %231, %cst_100 [1] : vector<8x8xf32> to vector<8xf32>
    %233 = vector.shape_cast %232 : vector<8xf32> to vector<8x1xf32>
    %234 = arith.mulf %221, %226 : vector<8x128xf32>
    %cst_101 = arith.constant dense<0.000000e+00> : vector<8xf32>
    %235 = vector.multi_reduction <add>, %234, %cst_101 [1] : vector<8x128xf32> to vector<8xf32>
    %236 = vector.shape_cast %235 : vector<8xf32> to vector<8x1xf32>
    %cst_102 = arith.constant 5.000000e+00 : f32
    %237 = vector.broadcast %cst_102 : f32 to vector<8x1xf32>
    %238 = arith.mulf %236, %237 : vector<8x1xf32>
    %cst_103 = arith.constant 9.99999993E-9 : f32
    %239 = vector.broadcast %cst_103 : f32 to vector<8x1xf32>
    %240 = arith.addf %233, %239 : vector<8x1xf32>
    %241 = math.log %240 : vector<8x1xf32>
    %242 = arith.subf %241, %238 : vector<8x1xf32>
    %c5_104 = arith.constant 5 : index
    %c0_105 = arith.constant 0 : index
    %c0_106 = arith.constant 0 : index
    %243 = vector.load %arg2[%c5_104, %c0_105, %c0_106] : memref<6x8x1xf32, #tpu.memory_space<vmem>>, vector<1x8x1xf32>
    %244 = vector.shape_cast %243 : vector<1x8x1xf32> to vector<8x1xf32>
    %245 = vector.shape_cast %242 : vector<8x1xf32> to vector<1x8x1xf32>
    tpu.vector_store %arg2[%c5_104, %c0_105, %c0_106], %245 {strides = array<i32>} : memref<6x8x1xf32, #tpu.memory_space<vmem>>, vector<1x8x1xf32>,
    return
  }
}

</mosaic_0001>

<bundles_post_ra>
// kernel: crgcn_forward.5
= control target key start
LH: loop header
LB: loop body
LE: loop exit
PB: predicated region body
PF: predicated region fallthrough
CT: control target
= control target key end

     0   :  { %s893_s18 = smov 0   ;;  %s895_s19 = smov 0   ;;  %s989_s0 = inlined_call_operand.vmem [shape: bf16[64,64], index: 0, kind: input, shape index: {}]   ;;  %s990_s1 = inlined_call_operand.vmem [shape: bf16[64,128], index: 1, kind: input, shape index: {}]   ;;  %s991_s2 = inlined_call_operand.vmem [shape: bf16[128,128], index: 2, kind: input, shape index: {}]   ;;  %s992_s3 = inlined_call_operand.vmem [shape: f32[1,128], index: 3, kind: input, shape index: {}]   ;;  %s993_s4 = inlined_call_operand.vmem [shape: f32[64,128], index: 4, kind: input, shape index: {}]   ;;  %s994_s5 = inlined_call_operand.vmem [shape: f32[64,128], index: 5, kind: output, shape index: {}]  }
   0x1   :  { %s897_s20 = smov 0  }
   0x2 LB: > { %s27_s21 = sadd.s32 1, %s857_s19  ;;  %p711_p0 = scmp.ge.s32.totalorder %s861_s20, 1  ;;  %s861_s20 = sphi %s897_s20, %s15_s20   ;;  %s857_s19 = sphi %s895_s19, %s996_s19   ;;  %s853_s18 = sphi %s893_s18, %s995_s18  }
   0x3   : > { %p29_p1 = scmp.ge.s32.totalorder %s27_s21, 2  ;;  %p227_p2 = scmp.lt.s32.totalorder %s861_s20, 3 }
   0x5   : > { %s998_s21 = smov (%p29_p1, %s27_s21), 0  ;;  %p228_p3 = pnand %p711_p0, %p227_p2 }
   0x6   : > { %v809_v0 = vld [vmem:[%s990_s1] sm:$0xff] (!%p228_p3)   ;;  %s712_s24 = sshll.u32 (!%p228_p3), %s853_s18, 2  ;;  %v810_v1 = vld [vmem:[%s990_s1 + $0x8] sm:$0xff] (!%p228_p3)   ;;  %v811_v2 = vld [vmem:[%s990_s1 + $0x10] sm:$0xff] (!%p228_p3)   ;;  %vm354_vm0 = vcmask (!%p228_p3), 523264  }
   0x7   : > { %231 = sbr.rel (%p228_p3) target bundleno = 637 (0x27d), region = 40  ;;  %p269_p4 = scmp.lt.s32.totalorder (!%p228_p3), %s712_s24, 7  ;;  %753 = vmatprep.subr.bf16.mxu0 (!%p228_p3), %v809_v0  ;;  %v815_v3 = vld [vmem:[%s991_s2] sm:$0xff] (!%p228_p3)   ;;  %v816_v4 = vld [vmem:[%s991_s2 + $0x8] sm:$0xff] (!%p228_p3)   ;;  %v812_v6 = vld [vmem:[%s990_s1 + $0x18] sm:$0xff] (!%p228_p3)  }
   0x8   : > { %754 = vmatpush3.bf16.msra.mxu0 (!%p228_p3), %v809_v0  ;;  %765 = vmatprep.subr.bf16.mxu1 (!%p228_p3), %v815_v3  ;;  %v817_v7 = vld [vmem:[%s991_s2 + $0x10] sm:$0xff] (!%p228_p3)   ;;  %v818_v8 = vld [vmem:[%s991_s2 + $0x18] sm:$0xff] (!%p228_p3)   ;;  %v819_v10 = vld [vmem:[%s991_s2 + $0x20] sm:$0xff] (!%p228_p3)  }
   0x9   : > { %755 = vmatprep.subr.bf16.mxu0 (!%p228_p3), %v810_v1  ;;  %766 = vmatpush3.bf16.msra.mxu1 (!%p228_p3), %v815_v3  ;;  %v820_v11 = vld [vmem:[%s991_s2 + $0x28] sm:$0xff] (!%p228_p3)   ;;  %v821_v12 = vld [vmem:[%s991_s2 + $0x30] sm:$0xff] (!%p228_p3)   ;;  %v822_v13 = vld [vmem:[%s991_s2 + $0x38] sm:$0xff] (!%p228_p3)  }
   0xa   : > { %767 = vmatprep.subr.bf16.mxu1 (!%p228_p3), %v816_v4  ;;  %v726_v20 = vld [vmem:[%s992_s3] ss:$0 sm:$0xff] (!%p228_p3) }
   0xc   : > { %756 = vmatpush3.bf16.msra.mxu0 (!%p228_p3), %v810_v1 }
   0xd   : > { %757 = vmatprep.subr.bf16.mxu0 (!%p228_p3), %v811_v2  ;;  %768 = vmatpush3.bf16.msra.mxu1 (!%p228_p3), %v816_v4 }
   0xe   : > { %s1000_s24 = smov (!%p269_p4, %s712_s24), 7  ;;  %769 = vmatprep.subr.bf16.mxu1 %v817_v7 }
   0xf   : > { %s713_s6 = sshll.u32 %s1000_s24, 2  ;;  %s715_s7 = sshll.u32 %s1000_s24, 3 }
  0x10   : > { %s275_s9 = scalar_lea.vmem %s989_s0, %s713_s6  ;;  %758 = vmatpush3.bf16.msra.mxu0 %v811_v2  ;;  %s287_s10 = scalar_lea.vmem %s993_s4, %s715_s7 }
  0x11   : > { %v813_v5 = vld [vmem:[%s275_s9] sm:$0xff]   ;;  %759 = vmatprep.subr.bf16.mxu0 %v812_v6  ;;  %v814_v9 = vld [vmem:[%s275_s9 + $0x8] sm:$0xff]   ;;  %770 = vmatpush3.bf16.msra.mxu1 %v817_v7  ;;  %s293_s13 = scalar_lea.vmem %s994_s5, %s715_s7 }
  0x12   : > { %761 = vmatprep.mubr.msk.bf16.mxu0 %vm354_vm0, %v813_v5  ;;  %771 = vmatprep.subr.bf16.mxu1 %v818_v8  ;;  %v599_v62 = vld [vmem:[%s287_s10] sm:$0xff]  ;;  %v600_v4 = vld [vmem:[%s287_s10 + $0x8] sm:$0xff] }
  0x14   : > { %760 = vmatpush3.bf16.msra.mxu0 %v812_v6  ;;  %v601_v6 = vld [vmem:[%s287_s10 + $0x10] sm:$0xff] }
  0x15   : > { %772 = vmatpush3.bf16.msra.mxu1 %v818_v8 }
  0x16   : > { %773 = vmatprep.subr.bf16.mxu1 %v819_v10 }
  0x17   : > { %762 = vmatmul.mubr.msk.bf16.vlgmr.msra.gmra.mrb[0].mxu0 %vm354_vm0, %v814_v9  ;;  %v602_v9 = vld [vmem:[%s287_s10 + $0x18] sm:$0xff] }
  0x19   : > { %774 = vmatpush3.bf16.msra.mxu1 %v819_v10 }
  0x1a   : > { %775 = vmatprep.subr.bf16.mxu1 %v820_v11 }
  0x1d   : > { %776 = vmatpush3.bf16.msra.mxu1 %v820_v11 }
  0x1e   : > { %777 = vmatprep.subr.bf16.mxu1 %v821_v12 }
  0x21   : > { %778 = vmatpush3.bf16.msra.mxu1 %v821_v12 }
  0x22   : > { %779 = vmatprep.subr.bf16.mxu1 %v822_v13 }
  0x25   : > { %780 = vmatpush3.bf16.msra.mxu1 %v822_v13 }
  0xea   : > { %v763_v14 = vpop.f32.mrb[0].mxu0 }
  0xeb   : > { %v395_v15 = vpop.f32.mrb[1].mxu0 }
  0xec   : > { %v764_v16 = vpop.f32.mrb[2].mxu0 }
  0xed   : > { %v426_v17 = vpack.c.bf16 %v764_v16, %v763_v14  ;;  %v398_v18 = vpop.f32.mrb[3].mxu0 }
  0xee   : > { %v425_v19 = vpack.c.bf16 %v398_v18, %v395_v15 }
  0xf0   : > { %781 = vmatprep.mubr.bf16.mxu1 %v425_v19 }
  0xf1   : > { %782 = vmatmul.mubr.bf16.vlgmr.msra.gmra.mrb[0].mxu1 %v426_v17 }
 0x1c4   : > { %v783_v21 = vpop.f32.mrb[0].mxu1 }
 0x1c5   : > { %v958_v22 = vadd.f32 %v783_v21, %v726_v20  ;;  %v532_v23 = vpop.f32.mrb[1].mxu1 }
 0x1c6   : > { %v533_v24 = vadd.f32 %v726_v20, %v532_v23  ;;  %v784_v25 = vpop.f32.mrb[2].mxu1 }
 0x1c7   : > { %v960_v26 = vadd.f32 %v784_v25, %v726_v20  ;;  %v535_v27 = vpop.f32.mrb[3].mxu1  ;;  %v549_v28 = vmul.f32 %v958_v22, %v958_v22 }
 0x1c8   : > { %v964_v29 = vadd.f32 %v726_v20, %v535_v27  ;;  %v547_v30 = vmul.f32 %v533_v24, %v533_v24 }
 0x1c9   : > { %555 = vadd.xlane.f32.xlu1 %v549_v28  ;;  %v550_v31 = vmul.f32 %v960_v26, %v960_v26 }
 0x1ca   : > { %551 = vadd.xlane.f32.xlu0 %v547_v30  ;;  %v548_v32 = vmul.f32 %v964_v29, %v964_v29 }
 0x1cd   : > { %557 = vadd.xlane.f32.xlu1 %v550_v31 }
 0x1ce   : > { %553 = vadd.xlane.f32.xlu0 %v548_v32 }
 0x256   : > { %v556_v33 = vpop.xlane.xlu1 %555 }
 0x257   : > { %823 = vrsqrt.f32 %v556_v33  ;;  %v552_v34 = vpop.xlane.xlu0 %551  ;;  %vm575_vm1 = vcmp.eq.f32.partialorder %v556_v33, inf  ;;  %v578_v40 = vand.u32 2147483648, %v556_v33  ;;  %vm577_vm2 = vcmp.eq.f32.partialorder %v556_v33, 0.0 }
 0x258   : > { %825 = vrsqrt.f32 %v552_v34  ;;  %vm561_vm3 = vcmp.eq.f32.partialorder %v552_v34, inf  ;;  %v564_v43 = vand.u32 2147483648, %v552_v34  ;;  %vm563_vm4 = vcmp.eq.f32.partialorder %v552_v34, 0.0 }
 0x25a   : > { %v558_v35 = vpop.xlane.xlu1 %557 }
 0x25b   : > { %827 = vrsqrt.f32 %v558_v35  ;;  %v554_v36 = vpop.xlane.xlu0 %553  ;;  %vm582_vm5 = vcmp.eq.f32.partialorder %v558_v35, inf  ;;  %v585_v52 = vand.u32 2147483648, %v558_v35  ;;  %vm584_vm6 = vcmp.eq.f32.partialorder %v558_v35, 0.0 }
 0x25c   : > { %829 = vrsqrt.f32 %v554_v36  ;;  %vm568_vm7 = vcmp.eq.f32.partialorder %v554_v36, inf  ;;  %v571_v55 = vand.u32 2147483648, %v554_v36  ;;  %vm570_vm8 = vcmp.eq.f32.partialorder %v554_v36, 0.0 }
 0x261   : > { %v824_v37 = vpop.eup %823 }
 0x262   : > { %v826_v38 = vpop.eup %825  ;;  %v574_v39 = vmul.f32 %v824_v37, %v556_v33 }
 0x263   : > { %v560_v41 = vmul.f32 %v826_v38, %v552_v34 }
 0x264   : > { %v576_v42 = vsel %vm575_vm1, %v556_v33, %v574_v39 }
 0x265   : > { %v828_v44 = vpop.eup %827  ;;  %v579_v45 = vsel %vm577_vm2, %v578_v40, %v576_v42  ;;  %v562_v46 = vsel %vm561_vm3, %v552_v34, %v560_v41 }
 0x266   : > { %v830_v47 = vpop.eup %829  ;;  %v589_v48 = vmax.f32 %v579_v45, 1e-12  ;;  %v565_v49 = vsel %vm563_vm4, %v564_v43, %v562_v46  ;;  %v581_v50 = vmul.f32 %v828_v44, %v558_v35 }
 0x267   : > { %v587_v51 = vmax.f32 %v565_v49, 1e-12  ;;  %v567_v53 = vmul.f32 %v830_v47, %v554_v36 }
 0x268   : > { %v583_v54 = vsel %vm582_vm5, %v558_v35, %v581_v50 }
 0x269   : > { %831 = vrcp.f32 %v587_v51  ;;  %v586_v56 = vsel %vm584_vm6, %v585_v52, %v583_v54  ;;  %v569_v57 = vsel %vm568_vm7, %v554_v36, %v567_v53 }
 0x26a   : > { %833 = vrcp.f32 %v589_v48  ;;  %v590_v58 = vmax.f32 %v586_v56, 1e-12  ;;  %v572_v59 = vsel %vm570_vm8, %v571_v55, %v569_v57 }
 0x26b   : > { %v588_v60 = vmax.f32 %v572_v59, 1e-12 }
 0x26c   : > { %835 = vrcp.f32 %v590_v58 }
 0x26d   : > { %837 = vrcp.f32 %v588_v60 }
 0x273   : > { %v832_v61 = vpop.eup %831 }
 0x274   : > { %v834_v63 = vpop.eup %833  ;;  %v595_v0 = vmul.f32 %v832_v61, %v533_v24 }
 0x275   : > { %v597_v5 = vmul.f32 %v834_v63, %v958_v22 }
 0x276   : > { %v836_v1 = vpop.eup %835  ;;  %v603_v2 = vadd.f32 %v599_v62, %v595_v0 }
 0x277   : > { %v838_v3 = vpop.eup %837  ;;  %v598_v7 = vmul.f32 %v836_v1, %v960_v26  ;;  %v605_v11 = vadd.f32 %v601_v6, %v597_v5 }
 0x278   : > { %607 = vst [vmem:[%s293_s13] sm:$0xff] %v603_v2  ;;  %v596_v8 = vmul.f32 %v838_v3, %v964_v29 }
 0x279   : > { %v606_v12 = vadd.f32 %v602_v9, %v598_v7  ;;  %609 = vst [vmem:[%s293_s13 + $0x10] sm:$0xff] %v605_v11 }
 0x27a   : > { %v604_v10 = vadd.f32 %v600_v4, %v596_v8 }
 0x27b   : > { %610 = vst [vmem:[%s293_s13 + $0x18] sm:$0xff] %v606_v12 }
 0x27c   : > { %608 = vst [vmem:[%s293_s13 + $0x8] sm:$0xff] %v604_v10 }
 0x27d PF: > { %s15_s20 = sadd.s32 1, %s861_s20   ;;  %s995_s18 = smov %s857_s19 }
 0x27e   : > { %p12_p5 = scmp.ge.s32.totalorder %s15_s20, 4   ;;  %s996_s19 = smov %s998_s21 }
 0x280   :  { %14 = sbr.rel (!%p12_p5) target bundleno = 2 (0x2), region = 84 }

// kernel: crgcn_forward.9
= control target key start
LH: loop header
LB: loop body
LE: loop exit
PB: predicated region body
PF: predicated region fallthrough
CT: control target
= control target key end

     0   :  { %v841_v24 = vmov 0.0   ;;  %vm842_vm0 = vmmov 0   ;;  %s1118_s1 = inlined_call_operand.vmem [shape: f32[6,8,128], index: 1, kind: input, shape index: {}]   ;;  %s1119_s0 = inlined_call_operand.vmem [shape: f32[6,8,128], index: 0, kind: input, shape index: {}]   ;;  %s1120_s2 = inlined_call_operand.vmem [shape: f32[6,8,1], index: 2, kind: output, shape index: {}]  }
   0x1   :  { %v861_v0 = vld [vmem:[%s1118_s1] sm:$0xff]  ;;  %v871_v2 = vld [vmem:[%s1118_s1 + $0x8] sm:$0xff]  ;;  %v889_v8 = vld [vmem:[%s1118_s1 + $0x10] sm:$0xff]  ;;  %737 = vmatprep.subr.mxu0 %v841_v24  ;;  %742 = vmatprep.subr.mxu1 %v841_v24 }
   0x2   :  { %v866_v1 = vld [vmem:[%s1119_s0] sm:$0xff]  ;;  %v23_v3 = vmul.f32 %v861_v0, %v861_v0  ;;  %v880_v5 = vld [vmem:[%s1119_s0 + $0x8] sm:$0xff]  ;;  %v140_v6 = vmul.f32 %v871_v2, %v871_v2  ;;  %v894_v9 = vld [vmem:[%s1118_s1 + $0x18] sm:$0xff]  ;;  %v256_v10 = vmul.f32 %v889_v8, %v889_v8  ;;  %739 = vmatprep.mubr.msk.f32.mxu0 %vm842_vm0, %v841_v24  ;;  %744 = vmatprep.mubr.msk.f32.mxu1 %vm842_vm0, %v841_v24 }
   0x3   :  { %v13_v4 = vmul.f32 %v866_v1, %v866_v1  ;;  %v130_v7 = vmul.f32 %v880_v5, %v880_v5  ;;  %v372_v11 = vmul.f32 %v894_v9, %v894_v9  ;;  %v903_v12 = vld [vmem:[%s1119_s0 + $0x10] sm:$0xff]  ;;  %v908_v13 = vld [vmem:[%s1119_s0 + $0x18] sm:$0xff]  ;;  %v917_v16 = vld [vmem:[%s1118_s1 + $0x20] sm:$0xff] }
   0x4   :  { %24 = vadd.xlane.f32.xlu0 %v23_v3  ;;  %v246_v14 = vmul.f32 %v903_v12, %v903_v12  ;;  %v362_v15 = vmul.f32 %v908_v13, %v908_v13  ;;  %v922_v17 = vld [vmem:[%s1118_s1 + $0x28] sm:$0xff]  ;;  %v488_v18 = vmul.f32 %v917_v16, %v917_v16  ;;  %v931_v20 = vld [vmem:[%s1119_s0 + $0x20] sm:$0xff] }
   0x5   :  { %14 = vadd.xlane.f32.xlu1 %v13_v4  ;;  %v604_v19 = vmul.f32 %v922_v17, %v922_v17  ;;  %v936_v21 = vld [vmem:[%s1119_s0 + $0x28] sm:$0xff]  ;;  %v478_v22 = vmul.f32 %v931_v20, %v931_v20 }
   0x6   :  { %v594_v23 = vmul.f32 %v936_v21, %v936_v21 }
   0x8   :  { %141 = vadd.xlane.f32.xlu0 %v140_v6 }
   0x9   :  { %131 = vadd.xlane.f32.xlu1 %v130_v7 }
   0xc   :  { %257 = vadd.xlane.f32.xlu0 %v256_v10 }
   0xd   :  { %373 = vadd.xlane.f32.xlu1 %v372_v11 }
  0x10   :  { %247 = vadd.xlane.f32.xlu0 %v246_v14 }
  0x11   :  { %363 = vadd.xlane.f32.xlu1 %v362_v15 }
  0x14   :  { %489 = vadd.xlane.f32.xlu0 %v488_v18 }
  0x15   :  { %605 = vadd.xlane.f32.xlu1 %v604_v19 }
  0x18   :  { %479 = vadd.xlane.f32.xlu0 %v478_v22 }
  0x19   :  { %595 = vadd.xlane.f32.xlu1 %v594_v23 }
  0x91   :  { %v25_v25 = vpop.xlane.xlu0 %24 }
  0x92   :  { %v15_v26 = vpop.xlane.xlu1 %14  ;;  %769 = vrsqrt.f32 %v25_v25  ;;  %vm28_vm1 = vcmp.eq.f32.partialorder %v25_v25, inf  ;;  %vm30_vm2 = vcmp.eq.f32.partialorder %v25_v25, 0.0  ;;  %v31_v32 = vand.u32 2147483648, %v25_v25 }
  0x93   :  { %771 = vrsqrt.f32 %v15_v26  ;;  %vm18_vm3 = vcmp.eq.f32.partialorder %v15_v26, inf  ;;  %vm20_vm4 = vcmp.eq.f32.partialorder %v15_v26, 0.0  ;;  %v21_v35 = vand.u32 2147483648, %v15_v26 }
  0x95   :  { %v948_v27 = vpop.xlane.xlu0 %141 }
  0x96   :  { %v132_v28 = vpop.xlane.xlu1 %131  ;;  %773 = vrsqrt.f32 %v948_v27  ;;  %vm145_vm5 = vcmp.eq.f32.partialorder %v948_v27, inf  ;;  %v148_v39 = vand.u32 2147483648, %v948_v27  ;;  %vm147_vm9 = vcmp.eq.f32.partialorder %v948_v27, 0.0 }
  0x97   :  { %775 = vrsqrt.f32 %v132_v28  ;;  %vm135_vm6 = vcmp.eq.f32.partialorder %v132_v28, inf  ;;  %vm137_vm7 = vcmp.eq.f32.partialorder %v132_v28, 0.0  ;;  %v138_v43 = vand.u32 2147483648, %v132_v28 }
  0x99   :  { %v951_v29 = vpop.xlane.xlu0 %257 }
  0x9a   :  { %v953_v30 = vpop.xlane.xlu1 %373  ;;  %777 = vrsqrt.f32 %v951_v29  ;;  %vm261_vm8 = vcmp.eq.f32.partialorder %v951_v29, inf  ;;  %vm263_vm10 = vcmp.eq.f32.partialorder %v951_v29, 0.0  ;;  %v264_v47 = vand.u32 2147483648, %v951_v29 }
  0x9b   :  { %779 = vrsqrt.f32 %v953_v30  ;;  %vm377_vm11 = vcmp.eq.f32.partialorder %v953_v30, inf  ;;  %vm379_vm12 = vcmp.eq.f32.partialorder %v953_v30, 0.0  ;;  %v380_v54 = vand.u32 2147483648, %v953_v30 }
  0x9c   :  { %v770_v31 = vpop.eup %769 }
  0x9d   :  { %v772_v33 = vpop.eup %771  ;;  %v27_v34 = vmul.f32 %v770_v31, %v25_v25  ;;  %v957_v36 = vpop.xlane.xlu0 %247 }
  0x9e   :  { %v959_v37 = vpop.xlane.xlu1 %363  ;;  %v17_v38 = vmul.f32 %v772_v33, %v15_v26  ;;  %781 = vrsqrt.f32 %v957_v36  ;;  %vm251_vm13 = vcmp.eq.f32.partialorder %v957_v36, inf  ;;  %vm253_vm14 = vcmp.eq.f32.partialorder %v957_v36, 0.0 }
  0x9f   :  { %v29_v40 = vsel %vm28_vm1, %v25_v25, %v27_v34  ;;  %783 = vrsqrt.f32 %v959_v37  ;;  %v254_v60 = vand.u32 2147483648, %v957_v36  ;;  %vm367_vm15 = vcmp.eq.f32.partialorder %v959_v37, inf }
  0xa0   :  { %v774_v41 = vpop.eup %773  ;;  %v19_v42 = vsel %vm18_vm3, %v15_v26, %v17_v38  ;;  %v32_v44 = vsel %vm30_vm2, %v31_v32, %v29_v40  ;;  %vm369_vm1 = vcmp.eq.f32.partialorder %v959_v37, 0.0  ;;  %v370_v14 = vand.u32 2147483648, %v959_v37 }
  0xa1   :  { %v776_v45 = vpop.eup %775  ;;  %v22_v46 = vsel %vm20_vm4, %v21_v35, %v19_v42  ;;  %v971_v48 = vpop.xlane.xlu0 %489  ;;  %v36_v50 = vmax.f32 %v32_v44, 1e-08  ;;  %v144_v53 = vmul.f32 %v774_v41, %v948_v27 }
  0xa2   :  { %v973_v49 = vpop.xlane.xlu1 %605  ;;  %v33_v51 = vmax.f32 %v22_v46, 1e-08  ;;  %v134_v52 = vmul.f32 %v776_v45, %v132_v28  ;;  %785 = vrsqrt.f32 %v971_v48  ;;  %vm493_vm2 = vcmp.eq.f32.partialorder %v971_v48, inf }
  0xa3   :  { %787 = vrsqrt.f32 %v973_v49  ;;  %v146_v4 = vsel %vm145_vm5, %v948_v27, %v144_v53  ;;  %vm495_vm3 = vcmp.eq.f32.partialorder %v971_v48, 0.0  ;;  %vm609_vm4 = vcmp.eq.f32.partialorder %v973_v49, inf }
  0xa4   :  { %v778_v55 = vpop.eup %777  ;;  %789 = vrcp.f32 %v33_v51  ;;  %v136_v56 = vsel %vm135_vm6, %v132_v28, %v134_v52  ;;  %v149_v26 = vsel %vm147_vm9, %v148_v39, %v146_v4  ;;  %vm611_vm5 = vcmp.eq.f32.partialorder %v973_v49, 0.0 }
  0xa5   :  { %v780_v57 = vpop.eup %779  ;;  %v139_v58 = vsel %vm137_vm7, %v138_v43, %v136_v56  ;;  %v260_v59 = vmul.f32 %v778_v55, %v951_v29  ;;  %v987_v61 = vpop.xlane.xlu0 %479  ;;  %791 = vrcp.f32 %v36_v50  ;;  %v153_v31 = vmax.f32 %v149_v26, 1e-08 }
  0xa6   :  { %v989_v62 = vpop.xlane.xlu1 %595  ;;  %v150_v63 = vmax.f32 %v139_v58, 1e-08  ;;  %v376_v3 = vmul.f32 %v780_v57, %v953_v30  ;;  %793 = vrsqrt.f32 %v987_v61  ;;  %vm483_vm6 = vcmp.eq.f32.partialorder %v987_v61, inf }
  0xa7   :  { %v262_v6 = vsel %vm261_vm8, %v951_v29, %v260_v59  ;;  %795 = vrsqrt.f32 %v989_v62  ;;  %v496_v29 = vand.u32 2147483648, %v971_v48  ;;  %vm485_vm7 = vcmp.eq.f32.partialorder %v987_v61, 0.0 }
  0xa8   :  { %v782_v7 = vpop.eup %781  ;;  %v265_v10 = vsel %vm263_vm10, %v264_v47, %v262_v6  ;;  %v378_v11 = vsel %vm377_vm11, %v953_v30, %v376_v3  ;;  %797 = vrcp.f32 %v150_v63  ;;  %vm599_vm8 = vcmp.eq.f32.partialorder %v989_v62, inf }
  0xa9   :  { %v784_v15 = vpop.eup %783  ;;  %v269_v18 = vmax.f32 %v265_v10, 1e-08  ;;  %v381_v19 = vsel %vm379_vm12, %v380_v54, %v378_v11  ;;  %v250_v22 = vmul.f32 %v782_v7, %v957_v36  ;;  %vm601_vm9 = vcmp.eq.f32.partialorder %v989_v62, 0.0 }
  0xaa   :  { %v385_v23 = vmax.f32 %v381_v19, 1e-08  ;;  %v366_v25 = vmul.f32 %v784_v15, %v959_v37  ;;  %vm124_vm10 = vcmask 7168  }
  0xab   :  { %799 = vrcp.f32 %v269_v18  ;;  %v252_v28 = vsel %vm251_vm13, %v957_v36, %v250_v22  ;;  %v612_v36 = vand.u32 2147483648, %v973_v49 }
  0xac   :  { %v786_v30 = vpop.eup %785  ;;  %801 = vrcp.f32 %v385_v23  ;;  %v255_v32 = vsel %vm253_vm14, %v254_v60, %v252_v28  ;;  %v368_v33 = vsel %vm367_vm15, %v959_v37, %v366_v25 }
  0xad   :  { %v788_v27 = vpop.eup %787  ;;  %v266_v34 = vmax.f32 %v255_v32, 1e-08  ;;  %v371_v35 = vsel %vm369_vm1, %v370_v14, %v368_v33  ;;  %v492_v38 = vmul.f32 %v786_v30, %v971_v48  ;;  %803 = vrcp.f32 %v153_v31 }
  0xae   :  { %v790_v39 = vpop.eup %789  ;;  %v382_v40 = vmax.f32 %v371_v35, 1e-08  ;;  %v608_v41 = vmul.f32 %v788_v27, %v973_v49 }
  0xaf   :  { %v792_v42 = vpop.eup %791  ;;  %805 = vrcp.f32 %v266_v34  ;;  %v494_v43 = vsel %vm493_vm2, %v971_v48, %v492_v38  ;;  %v35_v37 = vmul.f32 %v790_v39, %v866_v1  ;;  %v486_v1 = vand.u32 2147483648, %v987_v61 }
  0xb0   :  { %v794_v44 = vpop.eup %793  ;;  %807 = vrcp.f32 %v382_v40  ;;  %v497_v45 = vsel %vm495_vm3, %v496_v29, %v494_v43  ;;  %v610_v46 = vsel %vm609_vm4, %v973_v49, %v608_v41  ;;  %v38_v47 = vmul.f32 %v792_v42, %v861_v0 }
  0xb1   :  { %v796_v50 = vpop.eup %795  ;;  %v501_v51 = vmax.f32 %v497_v45, 1e-08  ;;  %v613_v52 = vsel %vm611_vm5, %v612_v36, %v610_v46  ;;  %v482_v53 = vmul.f32 %v794_v44, %v987_v61  ;;  %v602_v49 = vand.u32 2147483648, %v989_v62 }
  0xb2   :  { %v617_v54 = vmax.f32 %v613_v52, 1e-08  ;;  %v598_v55 = vmul.f32 %v796_v50, %v989_v62  ;;  %738 = vmatpush3.xpose.msra.mxu0 %v38_v47  ;;  %v1047_v48 = vmul.f32 %v38_v47, %v35_v37  ;;  %v798_v56 = vpop.eup %797 }
  0xb3   :  { %809 = vrcp.f32 %v501_v51  ;;  %v484_v0 = vsel %vm483_vm6, %v987_v61, %v482_v53  ;;  %747 = vmatprep.subr.mxu0 %v841_v24  ;;  %v152_v61 = vmul.f32 %v798_v56, %v880_v5 }
  0xb4   :  { %811 = vrcp.f32 %v617_v54  ;;  %v487_v57 = vsel %vm485_vm7, %v486_v1, %v484_v0  ;;  %v600_v58 = vsel %vm599_vm8, %v989_v62, %v598_v55 }
  0xb5   :  { %v800_v59 = vpop.eup %799  ;;  %v498_v60 = vmax.f32 %v487_v57, 1e-08  ;;  %v603_v63 = vsel %vm601_vm9, %v602_v49, %v600_v58  ;;  %740 = vmatmul.mubr.f32.vlgmr.msra.gmra.mrb[0].mxu0 %v35_v37 }
  0xb6   :  { %v802_v3 = vpop.eup %801  ;;  %v614_v4 = vmax.f32 %v603_v63, 1e-08  ;;  %v271_v6 = vmul.f32 %v800_v59, %v889_v8  ;;  %749 = vmatprep.mubr.msk.f32.mxu0 %vm842_vm0, %v841_v24 }
  0xb7   :  { %v804_v7 = vpop.eup %803  ;;  %813 = vrcp.f32 %v498_v60  ;;  %v387_v14 = vmul.f32 %v802_v3, %v894_v9 }
  0xb8   :  { %815 = vrcp.f32 %v614_v4  ;;  %v155_v10 = vmul.f32 %v804_v7, %v871_v2  ;;  %748 = vmatpush3.xpose.msra.mxu0 %v271_v6 }
  0xb9   :  { %v806_v62 = vpop.eup %805  ;;  %757 = vmatprep.subr.mxu0 %v841_v24 }
  0xba   :  { %v808_v11 = vpop.eup %807  ;;  %743 = vmatpush3.xpose.msra.mxu1 %v155_v10  ;;  %v268_v5 = vmul.f32 %v806_v62, %v903_v12  ;;  %v1065_v15 = vmul.f32 %v155_v10, %v152_v61 }
  0xbb   :  { %752 = vmatprep.subr.mxu1 %v841_v24  ;;  %v384_v8 = vmul.f32 %v808_v11, %v908_v13 }
  0xbc   :  { %750 = vmatmul.mubr.f32.vlgmr.msra.gmra.mrb[2].mxu0 %v268_v5  ;;  %v1069_v18 = vmul.f32 %v271_v6, %v268_v5 }
  0xbd   :  { %v810_v2 = vpop.eup %809  ;;  %745 = vmatmul.mubr.f32.vlgmr.msra.gmra.mrb[0].mxu1 %v152_v61  ;;  %759 = vmatprep.mubr.msk.f32.mxu0 %vm842_vm0, %v841_v24  ;;  %v1073_v19 = vmul.f32 %v387_v14, %v384_v8 }
  0xbe   :  { %v812_v22 = vpop.eup %811  ;;  %753 = vmatpush3.xpose.msra.mxu1 %v387_v14  ;;  %754 = vmatprep.mubr.msk.f32.mxu1 %vm842_vm0, %v841_v24  ;;  %v503_v9 = vmul.f32 %v810_v2, %v917_v16 }
  0xbf   :  { %762 = vmatprep.subr.mxu1 %v841_v24  ;;  %v619_v12 = vmul.f32 %v812_v22, %v922_v17 }
  0xc0   :  { %758 = vmatpush3.xpose.msra.mxu0 %v503_v9 }
  0xc1   :  { %v814_v13 = vpop.eup %813  ;;  %755 = vmatmul.mubr.f32.vlgmr.msra.gmra.mrb[2].mxu1 %v384_v8 }
  0xc2   :  { %v816_v23 = vpop.eup %815  ;;  %763 = vmatpush3.xpose.msra.mxu1 %v619_v12  ;;  %764 = vmatprep.mubr.msk.f32.mxu1 %vm842_vm0, %v841_v24  ;;  %v500_v25 = vmul.f32 %v814_v13, %v931_v20  ;;  %vm112_vm0 = vcmask 64512  }
  0xc3   :  { %v616_v26 = vmul.f32 %v816_v23, %v936_v21 }
  0xc4   :  { %760 = vmatmul.mubr.f32.vlgmr.msra.gmra.mrb[4].mxu0 %v500_v25  ;;  %v580_v28 = vmul.f32 %v503_v9, %v500_v25 }
  0xc5   :  { %765 = vmatmul.mubr.f32.vlgmr.msra.gmra.mrb[4].mxu1 %v616_v26  ;;  %v696_v16 = vmul.f32 %v619_v12, %v616_v26 }
 0x188   :  { %v105_v29 = vpop.f32.mrb[0].mxu0 }
 0x189   :  { %v109_v31 = vmul.f32 5.0, %v105_v29  ;;  %v741_v30 = vpop.f32.mrb[1].mxu0 }
 0x18b   :  { %v110_v17 = vmul.f32 1.442695, %v109_v31 }
 0x18d   :  { %817 = vpow2.f32 %v110_v17 }
 0x18f   :  { %v338_v32 = vpop.f32.mrb[2].mxu0 }
 0x190   :  { %v222_v33 = vpop.f32.mrb[0].mxu1  ;;  %v342_v27 = vmul.f32 5.0, %v338_v32  ;;  %v751_v34 = vpop.f32.mrb[3].mxu0 }
 0x191   :  { %v226_v35 = vmul.f32 5.0, %v222_v33  ;;  %v746_v38 = vpop.f32.mrb[1].mxu1 }
 0x192   :  { %v343_v24 = vmul.f32 1.442695, %v342_v27 }
 0x193   :  { %v227_v39 = vmul.f32 1.442695, %v226_v35 }
 0x194   :  { %819 = vpow2.f32 %v343_v24  ;;  %v454_v20 = vpop.f32.mrb[2].mxu1 }
 0x195   :  { %821 = vpow2.f32 %v227_v39  ;;  %v458_v21 = vmul.f32 5.0, %v454_v20  ;;  %v756_v40 = vpop.f32.mrb[3].mxu1 }
 0x197   :  { %v818_v41 = vpop.eup %817  ;;  %v459_v36 = vmul.f32 1.442695, %v458_v21  ;;  %v570_v42 = vpop.f32.mrb[4].mxu0 }
 0x198   :  { %v113_v43 = vsel %vm112_vm0, %v818_v41, 0.0  ;;  %v574_v37 = vmul.f32 5.0, %v570_v42  ;;  %v686_v44 = vpop.f32.mrb[4].mxu1  ;;  %v761_v45 = vpop.f32.mrb[5].mxu0 }
 0x199   :  { %823 = vpow2.f32 %v459_v36  ;;  %114 = vadd.xlane.f32.xlu0 %v113_v43  ;;  %v690_v46 = vmul.f32 5.0, %v686_v44  ;;  %v766_v47 = vpop.f32.mrb[5].mxu1 }
 0x19a   :  { %v575_v50 = vmul.f32 1.442695, %v574_v37 }
 0x19b   :  { %v691_v51 = vmul.f32 1.442695, %v690_v46 }
 0x19c   :  { %825 = vpow2.f32 %v575_v50 }
 0x19d   :  { %827 = vpow2.f32 %v691_v51 }
 0x19e   :  { %v820_v52 = vpop.eup %819 }
 0x19f   :  { %v822_v53 = vpop.eup %821  ;;  %v345_v54 = vsel %vm112_vm0, %v820_v52, 0.0 }
 0x1a0   :  { %v229_v1 = vsel %vm112_vm0, %v822_v53, 0.0  ;;  %346 = vadd.xlane.f32.xlu0 %v345_v54 }
 0x1a1   :  { %230 = vadd.xlane.f32.xlu1 %v229_v1 }
 0x1a3   :  { %v824_v55 = vpop.eup %823 }
 0x1a4   :  { %v461_v56 = vsel %vm112_vm0, %v824_v55, 0.0 }
 0x1a5   :  { %462 = vadd.xlane.f32.xlu1 %v461_v56 }
 0x1a6   :  { %v826_v0 = vpop.eup %825 }
 0x1a7   :  { %v828_v49 = vpop.eup %827  ;;  %v577_v57 = vsel %vm112_vm0, %v826_v0, 0.0 }
 0x1a8   :  { %578 = vadd.xlane.f32.xlu0 %v577_v57  ;;  %v693_v58 = vsel %vm112_vm0, %v828_v49, 0.0 }
 0x1a9   :  { %694 = vadd.xlane.f32.xlu1 %v693_v58 }
 0x1ac   :  { %117 = vadd.xlane.f32.xlu0 %v1047_v48 }
 0x1ad   :  { %233 = vadd.xlane.f32.xlu1 %v1065_v15 }
 0x1b0   :  { %349 = vadd.xlane.f32.xlu0 %v1069_v18 }
 0x1b1   :  { %465 = vadd.xlane.f32.xlu1 %v1073_v19 }
 0x1b4   :  { %581 = vadd.xlane.f32.xlu0 %v580_v28 }
 0x1b5   :  { %697 = vadd.xlane.f32.xlu1 %v696_v16 }
 0x226   :  { %v115_v59 = vpop.xlane.xlu0 %114 }
 0x227   :  { %v120_v60 = vadd.f32 1e-08, %v115_v59 }
 0x229   :  { %829 = vlog2.f32 %v120_v60 }
 0x22d   :  { %v347_v63 = vpop.xlane.xlu0 %346 }
 0x22e   :  { %v231_v3 = vpop.xlane.xlu1 %230  ;;  %v352_v4 = vadd.f32 1e-08, %v347_v63 }
 0x22f   :  { %v236_v61 = vadd.f32 1e-08, %v231_v3 }
 0x230   :  { %831 = vlog2.f32 %v352_v4 }
 0x231   :  { %833 = vlog2.f32 %v236_v61 }
 0x232   :  { %v463_v6 = vpop.xlane.xlu1 %462 }
 0x233   :  { %v468_v7 = vadd.f32 1e-08, %v463_v6  ;;  %v830_v11 = vpop.eup %829 }
 0x234   :  { %v122_v8 = vmul.f32 0.6931472, %v830_v11 }
 0x235   :  { %835 = vlog2.f32 %v468_v7  ;;  %v579_v48 = vpop.xlane.xlu0 %578 }
 0x236   :  { %v584_v10 = vadd.f32 1e-08, %v579_v48  ;;  %v695_v62 = vpop.xlane.xlu1 %694 }
 0x237   :  { %v700_v14 = vadd.f32 1e-08, %v695_v62 }
 0x238   :  { %837 = vlog2.f32 %v584_v10 }
 0x239   :  { %839 = vlog2.f32 %v700_v14  ;;  %v118_v5 = vpop.xlane.xlu0 %117 }
 0x23a   :  { %v832_v15 = vpop.eup %831  ;;  %v119_v18 = vmul.f32 5.0, %v118_v5  ;;  %v234_v2 = vpop.xlane.xlu1 %233 }
 0x23b   :  { %v834_v19 = vpop.eup %833  ;;  %v235_v22 = vmul.f32 5.0, %v234_v2  ;;  %v354_v23 = vmul.f32 0.6931472, %v832_v15 }
 0x23c   :  { %v238_v9 = vmul.f32 0.6931472, %v834_v19  ;;  %v123_v12 = vsub.f32 %v122_v8, %v119_v18 }
 0x23d   :  { %v350_v13 = vpop.xlane.xlu0 %349 }
 0x23e   :  { %125 = vst.msk [vmem:[%s1120_s2] sm:$0xff] %vm124_vm10, %v123_v12  ;;  %v239_v25 = vsub.f32 %v238_v9, %v235_v22  ;;  %v351_v26 = vmul.f32 5.0, %v350_v13  ;;  %v466_v28 = vpop.xlane.xlu1 %465 }
 0x23f   :  { %v836_v16 = vpop.eup %835  ;;  %v467_v29 = vmul.f32 5.0, %v466_v28 }
 0x240   :  { %v470_v31 = vmul.f32 0.6931472, %v836_v16  ;;  %712 = vst.msk [vmem:[%s1120_s2 + $0x8] sm:$0xff] %vm124_vm10, %v239_v25  ;;  %v355_v30 = vsub.f32 %v354_v23, %v351_v26 }
 0x241   :  { %v582_v17 = vpop.xlane.xlu0 %581 }
 0x242   :  { %v838_v32 = vpop.eup %837  ;;  %715 = vst.msk [vmem:[%s1120_s2 + $0x10] sm:$0xff] %vm124_vm10, %v355_v30  ;;  %v471_v33 = vsub.f32 %v470_v31, %v467_v29  ;;  %v583_v27 = vmul.f32 5.0, %v582_v17  ;;  %v698_v34 = vpop.xlane.xlu1 %697 }
 0x243   :  { %v840_v35 = vpop.eup %839  ;;  %v586_v38 = vmul.f32 0.6931472, %v838_v32  ;;  %v699_v24 = vmul.f32 5.0, %v698_v34 }
 0x244   :  { %718 = vst.msk [vmem:[%s1120_s2 + $0x18] sm:$0xff] %vm124_vm10, %v471_v33  ;;  %v702_v39 = vmul.f32 0.6931472, %v840_v35 }
 0x245   :  { %v587_v20 = vsub.f32 %v586_v38, %v583_v27 }
 0x246   :  { %v703_v21 = vsub.f32 %v702_v39, %v699_v24 }
 0x247   :  { %721 = vst.msk [vmem:[%s1120_s2 + $0x20] sm:$0xff] %vm124_vm10, %v587_v20 }
 0x248   :  { %724 = vst.msk [vmem:[%s1120_s2 + $0x28] sm:$0xff] %vm124_vm10, %v703_v21 }

</bundles_post_ra>
